<compile_context>
chip_gen: v6e
topology: v6e:2x2x1
jax: 0.10.0
libtpu: 0.0.40
codegen_flags: <defaults>
</compile_context>

<pallas_src>
import math

import jax
import jax.numpy as jnp
from jax import lax
from jax.experimental import pallas as pl
from jax.experimental.pallas import tpu as pltpu

SELU_ALPHA = 1.6732632423543772
SELU_SCALE = 1.0507009873554805
BN_EPS = 1e-5


# ----------------------------------------------------------------------------
# In-kernel math helpers (all f32, lane-dense (rows, W*C) layout)
# ----------------------------------------------------------------------------
def _mish(z):
    # z * tanh(softplus(z)) with ONE exp:  with F = exp(-|z|),
    #   z >= 0: tanh(sp) = (1 + 2F) / (1 + 2F + 2F^2)
    #   z <  0: tanh(sp) = (F^2 + 2F) / (F^2 + 2F + 2)
    f = jnp.exp(-jnp.abs(z))
    f2 = f * f
    num = jnp.where(z >= 0.0, 1.0 + 2.0 * f, f2 + 2.0 * f)
    den = num + jnp.where(z >= 0.0, 2.0 * f2, 2.0)
    return z * (num / den)


def _selu(z):
    return SELU_SCALE * jnp.where(
        z > 0.0, z, SELU_ALPHA * (jnp.exp(jnp.minimum(z, 0.0)) - 1.0))


def _bn_batch(y, gamma_lane, beta_lane, inv_cnt, c, w):
    """Training-mode BatchNorm with batch statistics.

    y: (rows, W*C) with the channel of lane j being j % C.  Per-channel sums
    are formed with cyclic lane rotations by multiples of C (XLU).  When W is
    a power of two the rotation distance doubles each step (log2(W) steps);
    otherwise fall back to the linear chain.  Every lane ends up holding its
    own channel's statistic, so no broadcast-back is needed.
    """
    s = jnp.sum(y, axis=0, keepdims=True)        # (1, W*C)
    sq = jnp.sum(y * y, axis=0, keepdims=True)   # (1, W*C)
    if w & (w - 1) == 0:                         # log-tree all-reduce over W
        shift = c
        while shift < c * w:
            s = s + pltpu.roll(s, shift=shift, axis=1)
            sq = sq + pltpu.roll(sq, shift=shift, axis=1)
            shift *= 2
    else:                                        # linear fallback
        ts, tsq = s, sq
        for _ in range(w - 1):
            ts = pltpu.roll(ts, shift=c, axis=1)
            tsq = pltpu.roll(tsq, shift=c, axis=1)
            s = s + ts
            sq = sq + tsq
    mean = s * inv_cnt
    var = jnp.maximum(sq * inv_cnt - mean * mean, 0.0)   # biased, clamped
    scale = gamma_lane * lax.rsqrt(var + BN_EPS)
    offset = beta_lane - mean * scale
    return y * scale + offset


# ----------------------------------------------------------------------------
# Fused kernel: conv1 -> BN1 -> Mish -> conv2 -> BN2 -> SELU (whole batch)
# ----------------------------------------------------------------------------
def _make_fckb_kernel(nh, wc1, c, w, inv_cnt):
    def kernel(x1_ref, t1_ref, t2_ref, mp_ref, mn_ref,
               g1_ref, b1_ref, g2_ref, b2_ref, o_ref, ms_ref):
        # ---- conv1 (5x5 'same'): one im2col-style MXU matmul --------------
        y1 = jnp.dot(x1_ref[...], t1_ref[...],
                     preferred_element_type=jnp.float32)        # (NH, W*C1)
        z1 = _bn_batch(y1, g1_ref[...], b1_ref[...], inv_cnt, c, w)
        m = _mish(z1)

        # ---- conv2 (3x3 'same'): row shift via zero-padded scratch --------
        # ms holds [0, m[0..NH-1], 0]; two statically offset window reads give
        # m[r-1] / m[r+1]; masks zero rows that cross an image boundary.
        ms_ref[...] = jnp.zeros((nh + 2, wc1), jnp.float32)
        ms_ref[pl.ds(1, nh), :] = m
        m_prev = ms_ref[pl.ds(0, nh), :] * mp_ref[...]          # row r -> m[r-1]
        m_next = ms_ref[pl.ds(2, nh), :] * mn_ref[...]          # row r -> m[r+1]

        y2 = jnp.dot(m_prev, t2_ref[0], preferred_element_type=jnp.float32)
        y2 = y2 + jnp.dot(m, t2_ref[1], preferred_element_type=jnp.float32)
        y2 = y2 + jnp.dot(m_next, t2_ref[2], preferred_element_type=jnp.float32)

        z2 = _bn_batch(y2, g2_ref[...], b2_ref[...], inv_cnt, c, w)
        o_ref[...] = _selu(z2)

    return kernel


# ----------------------------------------------------------------------------
# Weight-only constant construction (runs ONCE in make_fckb)
# ----------------------------------------------------------------------------
def _row_toeplitz(w_hwio, W):
    """(K, K, Cin, Cout) HWIO weights -> per-kh (W*Cin, W*Cout) row-conv mats.

    T[kh, w_in*Cin+ci, w_out*Cout+co] = w[kh, w_in-w_out+p, ci, co] when the
    kw offset is inside the kernel, else 0 (encodes 'same' padding in W).
    """
    K, _, Cin, Cout = w_hwio.shape
    p = (K - 1) // 2
    wi = jnp.arange(W)
    kw = wi[:, None] - wi[None, :] + p                  # (w_in, w_out)
    valid = ((kw >= 0) & (kw < K)).astype(w_hwio.dtype)
    kw_c = jnp.clip(kw, 0, K - 1)
    blocks = w_hwio[:, kw_c, :, :]                      # (K, W, W, Cin, Cout)
    blocks = blocks * valid[None, :, :, None, None]
    return blocks.transpose(0, 1, 3, 2, 4).reshape(K, W * Cin, W * Cout)


def make_fckb(w1, w2, gamma1, beta1, gamma2, beta2, *, batch, height, width):
    """Precompute all weight-only constants once; return a jitted forward."""
    K1, _, Cin, C1 = w1.shape
    K2, _, C1b, C2 = w2.shape
    assert C1 == C1b == C2, "FCKB uses out_channels for both convs"
    assert K2 == 3, "second conv of FCKB is 3x3"
    N, H, W = batch, height, width
    NH = N * H
    WCin, WC1, WC2 = W * Cin, W * C1, W * C2
    p1 = (K1 - 1) // 2

    # block-Toeplitz conv matrices
    t1 = _row_toeplitz(w1, W).reshape(K1 * WCin, WC1)   # (K1*W*Cin, W*C1)
    t2 = _row_toeplitz(w2, W)                           # (K2, W*C1, W*C2)

    # image-boundary masks for the +/-1 H shifts of conv2 (lane-dense)
    h_idx = jnp.arange(NH, dtype=jnp.int32) % H
    mp = jnp.tile((h_idx > 0).astype(jnp.float32)[:, None], (1, WC1))
    mn = jnp.tile((h_idx < H - 1).astype(jnp.float32)[:, None], (1, WC1))

    # BN affine params tiled onto the (w, c) lane pattern
    g1 = jnp.tile(gamma1, W).reshape(1, WC1)
    b1 = jnp.tile(beta1, W).reshape(1, WC1)
    g2 = jnp.tile(gamma2, W).reshape(1, WC2)
    b2 = jnp.tile(beta2, W).reshape(1, WC2)

    kernel = _make_fckb_kernel(NH, WC1, C1, W, 1.0 / float(N * H * W))

    fckb_call = pl.pallas_call(
        kernel,
        out_shape=jax.ShapeDtypeStruct((NH, WC2), jnp.float32),
        grid=(1,),
        in_specs=[
            pl.BlockSpec((NH, K1 * WCin), lambda i: (0, 0)),
            pl.BlockSpec((K1 * WCin, WC1), lambda i: (0, 0)),
            pl.BlockSpec((K2, WC1, WC2), lambda i: (0, 0, 0)),
            pl.BlockSpec((NH, WC1), lambda i: (0, 0)),
            pl.BlockSpec((NH, WC1), lambda i: (0, 0)),
            pl.BlockSpec((1, WC1), lambda i: (0, 0)),
            pl.BlockSpec((1, WC1), lambda i: (0, 0)),
            pl.BlockSpec((1, WC2), lambda i: (0, 0)),
            pl.BlockSpec((1, WC2), lambda i: (0, 0)),
        ],
        out_specs=pl.BlockSpec((NH, WC2), lambda i: (0, 0)),
        scratch_shapes=[pltpu.VMEM((NH + 2, WC1), jnp.float32)],
        compiler_params=pltpu.CompilerParams(
            dimension_semantics=("arbitrary",)),
    )

    @jax.jit
    def fwd(x_nhwc):
        # Activation-dependent layout plumbing only (fused by XLA); all
        # weight-only constants above are jit-captured, not rebuilt per call.
        x_rows = x_nhwc.reshape(N, H, WCin).astype(jnp.float32)
        x_pad = jnp.pad(x_rows, ((0, 0), (p1, p1), (0, 0)))
        x1cat = jnp.concatenate(
            [x_pad[:, kh:kh + H, :].reshape(NH, WCin) for kh in range(K1)],
            axis=-1)                                     # (NH, K1*W*Cin)
        out = fckb_call(x1cat, t1, t2, mp, mn, g1, b1, g2, b2)
        return out.reshape(N, H, W, C2)

    return fwd


# ----------------------------------------------------------------------------
# Pure-JAX reference (for correctness check)
# ----------------------------------------------------------------------------
def fckb_reference(x_nhwc, w1, w2, gamma1, beta1, gamma2, beta2):
    dn = ("NHWC", "HWIO", "NHWC")
    y1 = lax.conv_general_dilated(x_nhwc, w1, (1, 1), "SAME", dimension_numbers=dn)
    mu1, v1 = y1.mean((0, 1, 2)), y1.var((0, 1, 2))
    z1 = (y1 - mu1) / jnp.sqrt(v1 + BN_EPS) * gamma1 + beta1
    m = z1 * jnp.tanh(jnp.maximum(z1, 0.0) + jnp.log1p(jnp.exp(-jnp.abs(z1))))
    y2 = lax.conv_general_dilated(m, w2, (1, 1), "SAME", dimension_numbers=dn)
    mu2, v2 = y2.mean((0, 1, 2)), y2.var((0, 1, 2))
    z2 = (y2 - mu2) / jnp.sqrt(v2 + BN_EPS) * gamma2 + beta2
    return jnp.where(z2 > 0.0, SELU_SCALE * z2,
                     SELU_SCALE * SELU_ALPHA * (jnp.exp(z2) - 1.0))


# ----------------------------------------------------------------------------
if __name__ == "__main__":
    N, Cin, Cout, H, W = 2, 4, 8, 16, 16

    key = jax.random.PRNGKey(0)
    kx, kw1, kw2 = jax.random.split(key, 3)

    # Deterministic parameter init (kaiming-uniform-style bounds, HWIO layout).
    bound1 = 1.0 / math.sqrt(Cin * 5 * 5)
    w1 = jax.random.uniform(kw1, (5, 5, Cin, Cout), jnp.float32, -bound1, bound1)
    bound2 = 1.0 / math.sqrt(Cout * 3 * 3)
    w2 = jax.random.uniform(kw2, (3, 3, Cout, Cout), jnp.float32, -bound2, bound2)
    gamma1 = jnp.ones((Cout,), jnp.float32)
    beta1 = jnp.zeros((Cout,), jnp.float32)
    gamma2 = jnp.ones((Cout,), jnp.float32)
    beta2 = jnp.zeros((Cout,), jnp.float32)
    # TODO(synk): BatchNorm running_mean/running_var buffer updates (training-mode
    # side effects) are not reproduced; only the forward output is computed.

    # Input in PyTorch NCHW convention, transposed to the kernel's NHWC layout.
    x_nchw = jax.random.normal(kx, (N, Cin, H, W), jnp.float32)
    x_nhwc = jnp.transpose(x_nchw, (0, 2, 3, 1))

    fckb = make_fckb(w1, w2, gamma1, beta1, gamma2, beta2,
                     batch=N, height=H, width=W)
    out = jax.block_until_ready(fckb(x_nhwc))

    ref = jax.block_until_ready(
        fckb_reference(x_nhwc, w1, w2, gamma1, beta1, gamma2, beta2))

    if not jnp.allclose(out, ref, atol=1e-3, rtol=1e-3):
        raise AssertionError(
            f"mismatch: max abs err = {float(jnp.max(jnp.abs(out - ref)))}")

    # NCHW view of the result (matches the PyTorch module's output layout).
    _ = jnp.transpose(out, (0, 3, 1, 2))
    print("KERNEL_OK")
</pallas_src>

<mosaic_0001>
module attributes {stable_mosaic.version = 11 : i64} {
  func.func @kernel(%arg0: i32, %arg1: memref<32x320xf32, #tpu.memory_space<vmem>>, %arg2: memref<320x128xf32, #tpu.memory_space<vmem>>, %arg3: memref<3x128x128xf32, #tpu.memory_space<vmem>>, %arg4: memref<32x128xf32, #tpu.memory_space<vmem>>, %arg5: memref<32x128xf32, #tpu.memory_space<vmem>>, %arg6: memref<1x128xf32, #tpu.memory_space<vmem>>, %arg7: memref<1x128xf32, #tpu.memory_space<vmem>>, %arg8: memref<1x128xf32, #tpu.memory_space<vmem>>, %arg9: memref<1x128xf32, #tpu.memory_space<vmem>>, %arg10: memref<32x128xf32, #tpu.memory_space<vmem>>, %arg11: memref<34x128xf32, #tpu.memory_space<vmem>>) attributes {dimension_semantics = [#tpu.dimension_semantics<arbitrary>], iteration_bounds = array<i64: 1>, scalar_prefetch = 0 : i64, scratch_operands = 1 : i64, tpu.core_type = #tpu.core_type<tc>, window_params = [{pipeline_mode = #tpu.pipeline_mode<synchronous>, transform_indices = @transform_0, window_bounds = array<i64: 32, 320>}, {pipeline_mode = #tpu.pipeline_mode<synchronous>, transform_indices = @transform_1, window_bounds = array<i64: 320, 128>}, {pipeline_mode = #tpu.pipeline_mode<synchronous>, transform_indices = @transform_2, window_bounds = array<i64: 3, 128, 128>}, {pipeline_mode = #tpu.pipeline_mode<synchronous>, transform_indices = @transform_3, window_bounds = array<i64: 32, 128>}, {pipeline_mode = #tpu.pipeline_mode<synchronous>, transform_indices = @transform_4, window_bounds = array<i64: 32, 128>}, {pipeline_mode = #tpu.pipeline_mode<synchronous>, transform_indices = @transform_5, window_bounds = array<i64: 1, 128>}, {pipeline_mode = #tpu.pipeline_mode<synchronous>, transform_indices = @transform_6, window_bounds = array<i64: 1, 128>}, {pipeline_mode = #tpu.pipeline_mode<synchronous>, transform_indices = @transform_7, window_bounds = array<i64: 1, 128>}, {pipeline_mode = #tpu.pipeline_mode<synchronous>, transform_indices = @transform_8, window_bounds = array<i64: 1, 128>}, {pipeline_mode = #tpu.pipeline_mode<synchronous>, transform_indices = @transform_9, window_bounds = array<i64: 32, 128>}]} {
    %c0 = arith.constant 0 : index
    %c0_0 = arith.constant 0 : index
    %0 = vector.load %arg1[%c0, %c0_0] : memref<32x320xf32, #tpu.memory_space<vmem>>, vector<32x320xf32>
    %c0_1 = arith.constant 0 : index
    %c0_2 = arith.constant 0 : index
    %1 = vector.load %arg2[%c0_1, %c0_2] : memref<320x128xf32, #tpu.memory_space<vmem>>, vector<320x128xf32>
    %cst = arith.constant dense<0.000000e+00> : vector<32x128xf32>
    %2 = tpu.matmul %0, %1, %cst {dimension_numbers = #tpu.dot_dimension_numbers<[1], [0], [0], [1], [0, 0, 1, 1], [], []>} : vector<32x320xf32>, vector<320x128xf32>, vector<32x128xf32> -> vector<32x128xf32>
    %c0_3 = arith.constant 0 : index
    %c0_4 = arith.constant 0 : index
    %3 = vector.load %arg6[%c0_3, %c0_4] : memref<1x128xf32, #tpu.memory_space<vmem>>, vector<1x128xf32>
    %c0_5 = arith.constant 0 : index
    %c0_6 = arith.constant 0 : index
    %4 = vector.load %arg7[%c0_5, %c0_6] : memref<1x128xf32, #tpu.memory_space<vmem>>, vector<1x128xf32>
    %cst_7 = arith.constant dense<0.000000e+00> : vector<128xf32>
    %5 = vector.multi_reduction <add>, %2, %cst_7 [0] : vector<32x128xf32> to vector<128xf32>
    %6 = vector.shape_cast %5 : vector<128xf32> to vector<1x128xf32>
    %7 = arith.mulf %2, %2 : vector<32x128xf32>
    %cst_8 = arith.constant dense<0.000000e+00> : vector<128xf32>
    %8 = vector.multi_reduction <add>, %7, %cst_8 [0] : vector<32x128xf32> to vector<128xf32>
    %9 = vector.shape_cast %8 : vector<128xf32> to vector<1x128xf32>
    %c8_i32 = arith.constant 8 : i32
    %10 = tpu.dynamic_rotate %6 by %c8_i32 dim 1 : vector<1x128xf32>, i32 -> vector<1x128xf32>
    %11 = arith.addf %6, %10 : vector<1x128xf32>
    %c8_i32_9 = arith.constant 8 : i32
    %12 = tpu.dynamic_rotate %9 by %c8_i32_9 dim 1 : vector<1x128xf32>, i32 -> vector<1x128xf32>
    %13 = arith.addf %9, %12 : vector<1x128xf32>
    %c16_i32 = arith.constant 16 : i32
    %14 = tpu.dynamic_rotate %11 by %c16_i32 dim 1 : vector<1x128xf32>, i32 -> vector<1x128xf32>
    %15 = arith.addf %11, %14 : vector<1x128xf32>
    %c16_i32_10 = arith.constant 16 : i32
    %16 = tpu.dynamic_rotate %13 by %c16_i32_10 dim 1 : vector<1x128xf32>, i32 -> vector<1x128xf32>
    %17 = arith.addf %13, %16 : vector<1x128xf32>
    %c32_i32 = arith.constant 32 : i32
    %18 = tpu.dynamic_rotate %15 by %c32_i32 dim 1 : vector<1x128xf32>, i32 -> vector<1x128xf32>
    %19 = arith.addf %15, %18 : vector<1x128xf32>
    %c32_i32_11 = arith.constant 32 : i32
    %20 = tpu.dynamic_rotate %17 by %c32_i32_11 dim 1 : vector<1x128xf32>, i32 -> vector<1x128xf32>
    %21 = arith.addf %17, %20 : vector<1x128xf32>
    %c64_i32 = arith.constant 64 : i32
    %22 = tpu.dynamic_rotate %19 by %c64_i32 dim 1 : vector<1x128xf32>, i32 -> vector<1x128xf32>
    %23 = arith.addf %19, %22 : vector<1x128xf32>
    %c64_i32_12 = arith.constant 64 : i32
    %24 = tpu.dynamic_rotate %21 by %c64_i32_12 dim 1 : vector<1x128xf32>, i32 -> vector<1x128xf32>
    %25 = arith.addf %21, %24 : vector<1x128xf32>
    %cst_13 = arith.constant 0.001953125 : f32
    %26 = vector.broadcast %cst_13 : f32 to vector<1x128xf32>
    %27 = arith.mulf %23, %26 : vector<1x128xf32>
    %cst_14 = arith.constant 0.001953125 : f32
    %28 = vector.broadcast %cst_14 : f32 to vector<1x128xf32>
    %29 = arith.mulf %25, %28 : vector<1x128xf32>
    %30 = arith.mulf %27, %27 : vector<1x128xf32>
    %31 = arith.subf %29, %30 : vector<1x128xf32>
    %cst_15 = arith.constant 0.000000e+00 : f32
    %32 = vector.broadcast %cst_15 : f32 to vector<1x128xf32>
    %33 = arith.maximumf %31, %32 : vector<1x128xf32>
    %cst_16 = arith.constant 9.99999974E-6 : f32
    %34 = vector.broadcast %cst_16 : f32 to vector<1x128xf32>
    %35 = arith.addf %33, %34 : vector<1x128xf32>
    %36 = math.rsqrt %35 : vector<1x128xf32>
    %37 = arith.mulf %3, %36 : vector<1x128xf32>
    %38 = arith.mulf %27, %37 : vector<1x128xf32>
    %39 = arith.subf %4, %38 : vector<1x128xf32>
    %40 = vector.broadcast %37 : vector<1x128xf32> to vector<32x128xf32>
    %41 = arith.mulf %2, %40 : vector<32x128xf32>
    %42 = vector.broadcast %39 : vector<1x128xf32> to vector<32x128xf32>
    %43 = arith.addf %41, %42 : vector<32x128xf32>
    %44 = math.absf %43 : vector<32x128xf32>
    %cst_17 = arith.constant 0.000000e+00 : f32
    %45 = vector.broadcast %cst_17 : f32 to vector<32x128xf32>
    %46 = arith.subf %45, %44 : vector<32x128xf32>
    %47 = math.exp %46 : vector<32x128xf32>
    %48 = arith.mulf %47, %47 : vector<32x128xf32>
    %cst_18 = arith.constant 0.000000e+00 : f32
    %49 = vector.broadcast %cst_18 : f32 to vector<32x128xf32>
    %50 = arith.cmpf oge, %43, %49 : vector<32x128xf32>
    %cst_19 = arith.constant 2.000000e+00 : f32
    %51 = vector.broadcast %cst_19 : f32 to vector<32x128xf32>
    %52 = arith.mulf %51, %47 : vector<32x128xf32>
    %cst_20 = arith.constant 1.000000e+00 : f32
    %53 = vector.broadcast %cst_20 : f32 to vector<32x128xf32>
    %54 = arith.addf %53, %52 : vector<32x128xf32>
    %cst_21 = arith.constant 2.000000e+00 : f32
    %55 = vector.broadcast %cst_21 : f32 to vector<32x128xf32>
    %56 = arith.mulf %55, %47 : vector<32x128xf32>
    %57 = arith.addf %48, %56 : vector<32x128xf32>
    %58 = arith.select %50, %54, %57 : vector<32x128xi1>, vector<32x128xf32>
    %cst_22 = arith.constant 0.000000e+00 : f32
    %59 = vector.broadcast %cst_22 : f32 to vector<32x128xf32>
    %60 = arith.cmpf oge, %43, %59 : vector<32x128xf32>
    %cst_23 = arith.constant 2.000000e+00 : f32
    %61 = vector.broadcast %cst_23 : f32 to vector<32x128xf32>
    %62 = arith.mulf %61, %48 : vector<32x128xf32>
    %cst_24 = arith.constant 2.000000e+00 : f32
    %63 = vector.broadcast %cst_24 : f32 to vector<32x128xf32>
    %64 = arith.select %60, %62, %63 : vector<32x128xi1>, vector<32x128xf32>
    %65 = arith.addf %58, %64 : vector<32x128xf32>
    %66 = arith.divf %58, %65 : vector<32x128xf32>
    %67 = arith.mulf %43, %66 : vector<32x128xf32>
    %cst_25 = arith.constant 0.000000e+00 : f32
    %68 = vector.broadcast %cst_25 : f32 to vector<34x128xf32>
    %c0_26 = arith.constant 0 : index
    %c0_27 = arith.constant 0 : index
    %69 = vector.load %arg11[%c0_26, %c0_27] : memref<34x128xf32, #tpu.memory_space<vmem>>, vector<34x128xf32>
    tpu.vector_store %arg11[%c0_26, %c0_27], %68 {strides = array<i32>} : memref<34x128xf32, #tpu.memory_space<vmem>>, vector<34x128xf32>,
    %c1 = arith.constant 1 : index
    %c0_28 = arith.constant 0 : index
    %70 = vector.load %arg11[%c1, %c0_28] : memref<34x128xf32, #tpu.memory_space<vmem>>, vector<32x128xf32>
    tpu.vector_store %arg11[%c1, %c0_28], %67 {strides = array<i32>} : memref<34x128xf32, #tpu.memory_space<vmem>>, vector<32x128xf32>,
    %c0_29 = arith.constant 0 : index
    %c0_30 = arith.constant 0 : index
    %71 = vector.load %arg11[%c0_29, %c0_30] : memref<34x128xf32, #tpu.memory_space<vmem>>, vector<32x128xf32>
    %c0_31 = arith.constant 0 : index
    %c0_32 = arith.constant 0 : index
    %72 = vector.load %arg4[%c0_31, %c0_32] : memref<32x128xf32, #tpu.memory_space<vmem>>, vector<32x128xf32>
    %73 = arith.mulf %71, %72 : vector<32x128xf32>
    %c2 = arith.constant 2 : index
    %c0_33 = arith.constant 0 : index
    %74 = vector.load %arg11[%c2, %c0_33] : memref<34x128xf32, #tpu.memory_space<vmem>>, vector<32x128xf32>
    %c0_34 = arith.constant 0 : index
    %c0_35 = arith.constant 0 : index
    %75 = vector.load %arg5[%c0_34, %c0_35] : memref<32x128xf32, #tpu.memory_space<vmem>>, vector<32x128xf32>
    %76 = arith.mulf %74, %75 : vector<32x128xf32>
    %c0_36 = arith.constant 0 : index
    %c0_37 = arith.constant 0 : index
    %c0_38 = arith.constant 0 : index
    %77 = vector.load %arg3[%c0_36, %c0_37, %c0_38] : memref<3x128x128xf32, #tpu.memory_space<vmem>>, vector<1x128x128xf32>
    %78 = vector.shape_cast %77 : vector<1x128x128xf32> to vector<128x128xf32>
    %cst_39 = arith.constant dense<0.000000e+00> : vector<32x128xf32>
    %79 = tpu.matmul %73, %78, %cst_39 {dimension_numbers = #tpu.dot_dimension_numbers<[1], [0], [0], [1], [0, 0, 1, 1], [], []>} : vector<32x128xf32>, vector<128x128xf32>, vector<32x128xf32> -> vector<32x128xf32>
    %c1_40 = arith.constant 1 : index
    %c0_41 = arith.constant 0 : index
    %c0_42 = arith.constant 0 : index
    %80 = vector.load %arg3[%c1_40, %c0_41, %c0_42] : memref<3x128x128xf32, #tpu.memory_space<vmem>>, vector<1x128x128xf32>
    %81 = vector.shape_cast %80 : vector<1x128x128xf32> to vector<128x128xf32>
    %cst_43 = arith.constant dense<0.000000e+00> : vector<32x128xf32>
    %82 = tpu.matmul %67, %81, %cst_43 {dimension_numbers = #tpu.dot_dimension_numbers<[1], [0], [0], [1], [0, 0, 1, 1], [], []>} : vector<32x128xf32>, vector<128x128xf32>, vector<32x128xf32> -> vector<32x128xf32>
    %83 = arith.addf %79, %82 : vector<32x128xf32>
    %c2_44 = arith.constant 2 : index
    %c0_45 = arith.constant 0 : index
    %c0_46 = arith.constant 0 : index
    %84 = vector.load %arg3[%c2_44, %c0_45, %c0_46] : memref<3x128x128xf32, #tpu.memory_space<vmem>>, vector<1x128x128xf32>
    %85 = vector.shape_cast %84 : vector<1x128x128xf32> to vector<128x128xf32>
    %cst_47 = arith.constant dense<0.000000e+00> : vector<32x128xf32>
    %86 = tpu.matmul %76, %85, %cst_47 {dimension_numbers = #tpu.dot_dimension_numbers<[1], [0], [0], [1], [0, 0, 1, 1], [], []>} : vector<32x128xf32>, vector<128x128xf32>, vector<32x128xf32> -> vector<32x128xf32>
    %87 = arith.addf %83, %86 : vector<32x128xf32>
    %c0_48 = arith.constant 0 : index
    %c0_49 = arith.constant 0 : index
    %88 = vector.load %arg8[%c0_48, %c0_49] : memref<1x128xf32, #tpu.memory_space<vmem>>, vector<1x128xf32>
    %c0_50 = arith.constant 0 : index
    %c0_51 = arith.constant 0 : index
    %89 = vector.load %arg9[%c0_50, %c0_51] : memref<1x128xf32, #tpu.memory_space<vmem>>, vector<1x128xf32>
    %cst_52 = arith.constant dense<0.000000e+00> : vector<128xf32>
    %90 = vector.multi_reduction <add>, %87, %cst_52 [0] : vector<32x128xf32> to vector<128xf32>
    %91 = vector.shape_cast %90 : vector<128xf32> to vector<1x128xf32>
    %92 = arith.mulf %87, %87 : vector<32x128xf32>
    %cst_53 = arith.constant dense<0.000000e+00> : vector<128xf32>
    %93 = vector.multi_reduction <add>, %92, %cst_53 [0] : vector<32x128xf32> to vector<128xf32>
    %94 = vector.shape_cast %93 : vector<128xf32> to vector<1x128xf32>
    %c8_i32_54 = arith.constant 8 : i32
    %95 = tpu.dynamic_rotate %91 by %c8_i32_54 dim 1 : vector<1x128xf32>, i32 -> vector<1x128xf32>
    %96 = arith.addf %91, %95 : vector<1x128xf32>
    %c8_i32_55 = arith.constant 8 : i32
    %97 = tpu.dynamic_rotate %94 by %c8_i32_55 dim 1 : vector<1x128xf32>, i32 -> vector<1x128xf32>
    %98 = arith.addf %94, %97 : vector<1x128xf32>
    %c16_i32_56 = arith.constant 16 : i32
    %99 = tpu.dynamic_rotate %96 by %c16_i32_56 dim 1 : vector<1x128xf32>, i32 -> vector<1x128xf32>
    %100 = arith.addf %96, %99 : vector<1x128xf32>
    %c16_i32_57 = arith.constant 16 : i32
    %101 = tpu.dynamic_rotate %98 by %c16_i32_57 dim 1 : vector<1x128xf32>, i32 -> vector<1x128xf32>
    %102 = arith.addf %98, %101 : vector<1x128xf32>
    %c32_i32_58 = arith.constant 32 : i32
    %103 = tpu.dynamic_rotate %100 by %c32_i32_58 dim 1 : vector<1x128xf32>, i32 -> vector<1x128xf32>
    %104 = arith.addf %100, %103 : vector<1x128xf32>
    %c32_i32_59 = arith.constant 32 : i32
    %105 = tpu.dynamic_rotate %102 by %c32_i32_59 dim 1 : vector<1x128xf32>, i32 -> vector<1x128xf32>
    %106 = arith.addf %102, %105 : vector<1x128xf32>
    %c64_i32_60 = arith.constant 64 : i32
    %107 = tpu.dynamic_rotate %104 by %c64_i32_60 dim 1 : vector<1x128xf32>, i32 -> vector<1x128xf32>
    %108 = arith.addf %104, %107 : vector<1x128xf32>
    %c64_i32_61 = arith.constant 64 : i32
    %109 = tpu.dynamic_rotate %106 by %c64_i32_61 dim 1 : vector<1x128xf32>, i32 -> vector<1x128xf32>
    %110 = arith.addf %106, %109 : vector<1x128xf32>
    %cst_62 = arith.constant 0.001953125 : f32
    %111 = vector.broadcast %cst_62 : f32 to vector<1x128xf32>
    %112 = arith.mulf %108, %111 : vector<1x128xf32>
    %cst_63 = arith.constant 0.001953125 : f32
    %113 = vector.broadcast %cst_63 : f32 to vector<1x128xf32>
    %114 = arith.mulf %110, %113 : vector<1x128xf32>
    %115 = arith.mulf %112, %112 : vector<1x128xf32>
    %116 = arith.subf %114, %115 : vector<1x128xf32>
    %cst_64 = arith.constant 0.000000e+00 : f32
    %117 = vector.broadcast %cst_64 : f32 to vector<1x128xf32>
    %118 = arith.maximumf %116, %117 : vector<1x128xf32>
    %cst_65 = arith.constant 9.99999974E-6 : f32
    %119 = vector.broadcast %cst_65 : f32 to vector<1x128xf32>
    %120 = arith.addf %118, %119 : vector<1x128xf32>
    %121 = math.rsqrt %120 : vector<1x128xf32>
    %122 = arith.mulf %88, %121 : vector<1x128xf32>
    %123 = arith.mulf %112, %122 : vector<1x128xf32>
    %124 = arith.subf %89, %123 : vector<1x128xf32>
    %125 = vector.broadcast %122 : vector<1x128xf32> to vector<32x128xf32>
    %126 = arith.mulf %87, %125 : vector<32x128xf32>
    %127 = vector.broadcast %124 : vector<1x128xf32> to vector<32x128xf32>
    %128 = arith.addf %126, %127 : vector<32x128xf32>
    %cst_66 = arith.constant 0.000000e+00 : f32
    %129 = vector.broadcast %cst_66 : f32 to vector<32x128xf32>
    %130 = arith.cmpf ogt, %128, %129 : vector<32x128xf32>
    %cst_67 = arith.constant 0.000000e+00 : f32
    %131 = vector.broadcast %cst_67 : f32 to vector<32x128xf32>
    %132 = arith.minimumf %128, %131 : vector<32x128xf32>
    %133 = math.exp %132 : vector<32x128xf32>
    %cst_68 = arith.constant 1.000000e+00 : f32
    %134 = vector.broadcast %cst_68 : f32 to vector<32x128xf32>
    %135 = arith.subf %133, %134 : vector<32x128xf32>
    %cst_69 = arith.constant 1.67326319 : f32
    %136 = vector.broadcast %cst_69 : f32 to vector<32x128xf32>
    %137 = arith.mulf %136, %135 : vector<32x128xf32>
    %138 = arith.select %130, %128, %137 : vector<32x128xi1>, vector<32x128xf32>
    %cst_70 = arith.constant 1.05070102 : f32
    %139 = vector.broadcast %cst_70 : f32 to vector<32x128xf32>
    %140 = arith.mulf %139, %138 : vector<32x128xf32>
    %c0_71 = arith.constant 0 : index
    %c0_72 = arith.constant 0 : index
    %141 = vector.load %arg10[%c0_71, %c0_72] : memref<32x128xf32, #tpu.memory_space<vmem>>, vector<32x128xf32>
    tpu.vector_store %arg10[%c0_71, %c0_72], %140 {strides = array<i32>} : memref<32x128xf32, #tpu.memory_space<vmem>>, vector<32x128xf32>,
    return
  }
  func.func @transform_0(%arg0: i32) -> (i32, i32) {
    %c0_i32 = arith.constant 0 : i32
    %c0_i32_0 = arith.constant 0 : i32
    %c0_i32_1 = arith.constant 0 : i32
    return %c0_i32, %c0_i32_0 : i32, i32
  }
  func.func @transform_1(%arg0: i32) -> (i32, i32) {
    %c0_i32 = arith.constant 0 : i32
    %c0_i32_0 = arith.constant 0 : i32
    %c0_i32_1 = arith.constant 0 : i32
    return %c0_i32, %c0_i32_0 : i32, i32
  }
  func.func @transform_2(%arg0: i32) -> (i32, i32, i32) {
    %c0_i32 = arith.constant 0 : i32
    %c0_i32_0 = arith.constant 0 : i32
    %c0_i32_1 = arith.constant 0 : i32
    %c0_i32_2 = arith.constant 0 : i32
    return %c0_i32, %c0_i32_0, %c0_i32_1 : i32, i32, i32
  }
  func.func @transform_3(%arg0: i32) -> (i32, i32) {
    %c0_i32 = arith.constant 0 : i32
    %c0_i32_0 = arith.constant 0 : i32
    %c0_i32_1 = arith.constant 0 : i32
    return %c0_i32, %c0_i32_0 : i32, i32
  }
  func.func @transform_4(%arg0: i32) -> (i32, i32) {
    %c0_i32 = arith.constant 0 : i32
    %c0_i32_0 = arith.constant 0 : i32
    %c0_i32_1 = arith.constant 0 : i32
    return %c0_i32, %c0_i32_0 : i32, i32
  }
  func.func @transform_5(%arg0: i32) -> (i32, i32) {
    %c0_i32 = arith.constant 0 : i32
    %c0_i32_0 = arith.constant 0 : i32
    %c0_i32_1 = arith.constant 0 : i32
    return %c0_i32, %c0_i32_0 : i32, i32
  }
  func.func @transform_6(%arg0: i32) -> (i32, i32) {
    %c0_i32 = arith.constant 0 : i32
    %c0_i32_0 = arith.constant 0 : i32
    %c0_i32_1 = arith.constant 0 : i32
    return %c0_i32, %c0_i32_0 : i32, i32
  }
  func.func @transform_7(%arg0: i32) -> (i32, i32) {
    %c0_i32 = arith.constant 0 : i32
    %c0_i32_0 = arith.constant 0 : i32
    %c0_i32_1 = arith.constant 0 : i32
    return %c0_i32, %c0_i32_0 : i32, i32
  }
  func.func @transform_8(%arg0: i32) -> (i32, i32) {
    %c0_i32 = arith.constant 0 : i32
    %c0_i32_0 = arith.constant 0 : i32
    %c0_i32_1 = arith.constant 0 : i32
    return %c0_i32, %c0_i32_0 : i32, i32
  }
  func.func @transform_9(%arg0: i32) -> (i32, i32) {
    %c0_i32 = arith.constant 0 : i32
    %c0_i32_0 = arith.constant 0 : i32
    %c0_i32_1 = arith.constant 0 : i32
    return %c0_i32, %c0_i32_0 : i32, i32
  }
}

</mosaic_0001>

<bundles_post_ra>
// kernel: fwd.1
= control target key start
LH: loop header
LB: loop body
LE: loop exit
PB: predicated region body
PF: predicated region fallthrough
CT: control target
= control target key end

     0   :  { %vm84_vm0 = vcmask 523264   ;;  %s1195_s28 = smov 16   ;;  %s1196_s29 = smov 32   ;;  %s1709_s1 = inlined_call_operand.vmem [shape: f32[320,128], index: 1, kind: input, shape index: {}]   ;;  %s1710_s0 = inlined_call_operand.vmem [shape: f32[32,320], index: 0, kind: input, shape index: {}]   ;;  %s1711_s2 = inlined_call_operand.vmem [shape: f32[3,128,128], index: 2, kind: input, shape index: {}]   ;;  %s1712_s5 = inlined_call_operand.vmem [shape: f32[1,128], index: 5, kind: input, shape index: {}, may-alias: {5,7}]   ;;  %s1713_s6 = inlined_call_operand.vmem [shape: f32[1,128], index: 6, kind: input, shape index: {}, may-alias: {6,8}]   ;;  %s1714_s3 = inlined_call_operand.vmem [shape: f32[32,128], index: 3, kind: input, shape index: {}]   ;;  %s1715_s4 = inlined_call_operand.vmem [shape: f32[32,128], index: 4, kind: input, shape index: {}]   ;;  %s1716_s7 = inlined_call_operand.vmem [shape: f32[1,128], index: 7, kind: input, shape index: {}, may-alias: {5,7}]   ;;  %s1717_s8 = inlined_call_operand.vmem [shape: f32[1,128], index: 8, kind: input, shape index: {}, may-alias: {6,8}]   ;;  %s1718_s9 = inlined_call_operand.vmem [shape: f32[32,128], index: 9, kind: output, shape index: {}]  }
   0x1   :  { %v75_v0 = vld [vmem:[%s1709_s1 + $0xf8] sm:$0xff]  ;;  %v74_v2 = vld [vmem:[%s1709_s1 + $0xf0] sm:$0xff]  ;;  %v73_v4 = vld [vmem:[%s1709_s1 + $0xe8] sm:$0xff]  ;;  %s1197_s30 = smov 64  }
   0x2   :  { %v59_v1 = vld [vmem:[%s1709_s1 + $0x78] sm:$0xff]  ;;  %909 = vmatprep.subr.mxu0 %v75_v0  ;;  %v58_v3 = vld [vmem:[%s1709_s1 + $0x70] sm:$0xff]  ;;  %v57_v5 = vld [vmem:[%s1709_s1 + $0x68] sm:$0xff] }
   0x3   :  { %910 = vmatpush3.msra.mxu0 %v59_v1  ;;  %v72_v6 = vld [vmem:[%s1709_s1 + $0xe0] sm:$0xff]  ;;  %v71_v8 = vld [vmem:[%s1709_s1 + $0xd8] sm:$0xff]  ;;  %v82_v11 = vld [vmem:[%s1709_s1 + $0x130] sm:$0xff] }
   0x4   :  { %911 = vmatprep.subr.mxu0 %v74_v2  ;;  %v56_v7 = vld [vmem:[%s1709_s1 + $0x60] sm:$0xff]  ;;  %v83_v9 = vld [vmem:[%s1709_s1 + $0x138] sm:$0xff]  ;;  %v70_v12 = vld [vmem:[%s1709_s1 + $0xd0] sm:$0xff] }
   0x5   :  { %912 = vmatpush3.msra.mxu0 %v58_v3  ;;  %v55_v10 = vld [vmem:[%s1709_s1 + $0x58] sm:$0xff]  ;;  %1025 = vmatprep.subr.mxu1 %v83_v9  ;;  %v81_v13 = vld [vmem:[%s1709_s1 + $0x128] sm:$0xff]  ;;  %v54_v14 = vld [vmem:[%s1709_s1 + $0x50] sm:$0xff] }
   0x6   :  { %913 = vmatprep.subr.mxu0 %v73_v4  ;;  %1026 = vmatpush3.msra.mxu1 %v83_v9  ;;  %v69_v15 = vld [vmem:[%s1709_s1 + $0xc8] sm:$0xff]  ;;  %v80_v16 = vld [vmem:[%s1709_s1 + $0x120] sm:$0xff]  ;;  %v79_v19 = vld [vmem:[%s1709_s1 + $0x118] sm:$0xff] }
   0x7   :  { %914 = vmatpush3.msra.mxu0 %v57_v5  ;;  %1027 = vmatprep.subr.mxu1 %v82_v11  ;;  %v53_v17 = vld [vmem:[%s1709_s1 + $0x48] sm:$0xff]  ;;  %v68_v18 = vld [vmem:[%s1709_s1 + $0xc0] sm:$0xff]  ;;  %v67_v21 = vld [vmem:[%s1709_s1 + $0xb8] sm:$0xff] }
   0x8   :  { %915 = vmatprep.subr.mxu0 %v72_v6  ;;  %1028 = vmatpush3.msra.mxu1 %v82_v11  ;;  %v52_v20 = vld [vmem:[%s1709_s1 + $0x40] sm:$0xff]  ;;  %v78_v22 = vld [vmem:[%s1709_s1 + $0x110] sm:$0xff]  ;;  %v51_v23 = vld [vmem:[%s1709_s1 + $0x38] sm:$0xff] }
   0x9   :  { %916 = vmatpush3.msra.mxu0 %v56_v7  ;;  %1029 = vmatprep.subr.mxu1 %v81_v13  ;;  %v66_v24 = vld [vmem:[%s1709_s1 + $0xb0] sm:$0xff]  ;;  %v77_v25 = vld [vmem:[%s1709_s1 + $0x108] sm:$0xff]  ;;  %v76_v30 = vld [vmem:[%s1709_s1 + $0x100] sm:$0xff] }
   0xa   :  { %917 = vmatprep.subr.mxu0 %v71_v8  ;;  %1030 = vmatpush3.msra.mxu1 %v81_v13  ;;  %v50_v26 = vld [vmem:[%s1709_s1 + $0x30] sm:$0xff]  ;;  %v33_v27 = vld [vmem:[%s1710_s0 + $0x8] sm:$0xff]  ;;  %v64_v31 = vld [vmem:[%s1709_s1 + $0xa0] sm:$0xff] }
   0xb   :  { %918 = vmatpush3.msra.mxu0 %v55_v10  ;;  %1031 = vmatprep.subr.mxu1 %v80_v16  ;;  %v65_v28 = vld [vmem:[%s1709_s1 + $0xa8] sm:$0xff]  ;;  %v48_v32 = vld [vmem:[%s1709_s1 + $0x20] sm:$0xff]  ;;  %v34_v33 = vld [vmem:[%s1710_s0 + $0x10] sm:$0xff] }
   0xc   :  { %919 = vmatprep.subr.mxu0 %v70_v12  ;;  %1032 = vmatpush3.msra.mxu1 %v80_v16  ;;  %v49_v29 = vld [vmem:[%s1709_s1 + $0x28] sm:$0xff]  ;;  %v63_v34 = vld [vmem:[%s1709_s1 + $0x98] sm:$0xff]  ;;  %v40_v37 = vld [vmem:[%s1710_s0 + $0x40] sm:$0xff] }
   0xd   :  { %920 = vmatpush3.msra.mxu0 %v54_v14  ;;  %1033 = vmatprep.subr.mxu1 %v79_v19  ;;  %v37_v35 = vld [vmem:[%s1710_s0 + $0x28] sm:$0xff]  ;;  %v47_v36 = vld [vmem:[%s1709_s1 + $0x18] sm:$0xff]  ;;  %v62_v38 = vld [vmem:[%s1709_s1 + $0x90] sm:$0xff] }
   0xe   :  { %921 = vmatprep.subr.mxu0 %v69_v15  ;;  %1034 = vmatpush3.msra.mxu1 %v79_v19  ;;  %v46_v39 = vld [vmem:[%s1709_s1 + $0x10] sm:$0xff]  ;;  %v61_v40 = vld [vmem:[%s1709_s1 + $0x88] sm:$0xff]  ;;  %v43_v41 = vld [vmem:[%s1710_s0 + $0x58] sm:$0xff] }
   0xf   :  { %922 = vmatpush3.msra.mxu0 %v53_v17  ;;  %1035 = vmatprep.subr.mxu1 %v78_v22  ;;  %v45_v42 = vld [vmem:[%s1709_s1 + $0x8] sm:$0xff]  ;;  %v60_v43 = vld [vmem:[%s1709_s1 + $0x80] sm:$0xff]  ;;  %v35_v47 = vld [vmem:[%s1710_s0 + $0x18] sm:$0xff] }
  0x10   :  { %923 = vmatprep.subr.mxu0 %v68_v18  ;;  %1036 = vmatpush3.msra.mxu1 %v78_v22  ;;  %v44_v44 = vld [vmem:[%s1709_s1] sm:$0xff]  ;;  %v39_v48 = vld [vmem:[%s1710_s0 + $0x38] sm:$0xff]  ;;  %v38_v49 = vld [vmem:[%s1710_s0 + $0x30] sm:$0xff] }
  0x11   :  { %924 = vmatpush3.msra.mxu0 %v52_v20  ;;  %1037 = vmatprep.subr.mxu1 %v77_v25  ;;  %v32_v45 = vld [vmem:[%s1710_s0] sm:$0xff]  ;;  %v42_v50 = vld [vmem:[%s1710_s0 + $0x50] sm:$0xff]  ;;  %v41_v51 = vld [vmem:[%s1710_s0 + $0x48] sm:$0xff] }
  0x12   :  { %925 = vmatprep.subr.mxu0 %v67_v21  ;;  %161 = vmatprep.mubr.f32.mxu0 %v33_v27  ;;  %v36_v46 = vld [vmem:[%s1710_s0 + $0x20] sm:$0xff]  ;;  %s1194_s0 = smov 8  }
  0x13   :  { %926 = vmatpush3.msra.mxu0 %v51_v23  ;;  %1038 = vmatpush3.msra.mxu1 %v77_v25 }
  0x14   :  { %927 = vmatprep.subr.mxu0 %v66_v24  ;;  %1039 = vmatprep.subr.mxu1 %v76_v30 }
  0x15   :  { %928 = vmatpush3.msra.mxu0 %v50_v26  ;;  %1040 = vmatpush3.msra.mxu1 %v76_v30 }
  0x16   :  { %929 = vmatprep.subr.mxu0 %v65_v28  ;;  %1041 = vmatprep.mubr.msk.f32.mxu1 %vm84_vm0, %v34_v33 }
  0x17   :  { %930 = vmatpush3.msra.mxu0 %v49_v29  ;;  %1042 = vmatmul.mubr.msk.f32.vlgmr.msra.gmra.mxu1 %vm84_vm0, %v37_v35 }
  0x18   :  { %931 = vmatprep.subr.mxu0 %v64_v31  ;;  %1044 = vmatprep.mubr.msk.f32.mxu1 %vm84_vm0, %v40_v37 }
  0x19   :  { %932 = vmatpush3.msra.mxu0 %v48_v32 }
  0x1a   :  { %933 = vmatprep.subr.mxu0 %v63_v34 }
  0x1b   :  { %934 = vmatpush3.msra.mxu0 %v47_v36  ;;  %1045 = vmatmul.mubr.msk.f32.gmra.mxu1 %vm84_vm0, %v43_v41 }
  0x1c   :  { %935 = vmatprep.subr.mxu0 %v62_v38 }
  0x1d   :  { %936 = vmatpush3.msra.mxu0 %v46_v39 }
  0x1e   :  { %937 = vmatprep.subr.mxu0 %v61_v40 }
  0x1f   :  { %938 = vmatpush3.msra.mxu0 %v45_v42  ;;  %v888_v42 = vld [vmem:[%s1711_s2 + $0xf8] sm:$0xff] }
  0x20   :  { %939 = vmatprep.subr.mxu0 %v60_v43  ;;  %v887_v43 = vld [vmem:[%s1711_s2 + $0xf0] sm:$0xff]  ;;  %1047 = vmatprep.subr.mxu1 %v888_v42 }
  0x21   :  { %940 = vmatpush3.msra.mxu0 %v44_v44  ;;  %1048 = vmatpush3.msra.mxu1 %v888_v42  ;;  %v886_v44 = vld [vmem:[%s1711_s2 + $0xe8] sm:$0xff] }
  0x22   :  { %162 = vmatmul.mubr.f32.vlgmr.msra.gmra.mxu0 %v32_v45  ;;  %v457_v45 = vld [vmem:[%s1711_s2 + $0x78] sm:$0xff]  ;;  %1049 = vmatprep.subr.mxu1 %v887_v43 }
  0x23   :  { %166 = vmatprep.mubr.f32.mxu0 %v36_v46  ;;  %v456_v46 = vld [vmem:[%s1711_s2 + $0x70] sm:$0xff]  ;;  %1085 = vmatprep.subr.mxu0 %v457_v45 }
  0x24   :  { %1050 = vmatpush3.msra.mxu1 %v887_v43  ;;  %1086 = vmatpush3.msra.mxu0 %v457_v45 }
  0x25   :  { %1051 = vmatprep.subr.mxu1 %v886_v44  ;;  %1087 = vmatprep.subr.mxu0 %v456_v46 }
  0x26   :  { %167 = vmatmul.mubr.f32.gmra.mxu0 %v35_v47  ;;  %v885_v47 = vld [vmem:[%s1711_s2 + $0xe0] sm:$0xff]  ;;  %1052 = vmatpush3.msra.mxu1 %v886_v44 }
  0x27   :  { %171 = vmatprep.mubr.f32.mxu0 %v39_v48  ;;  %v455_v48 = vld [vmem:[%s1711_s2 + $0x68] sm:$0xff]  ;;  %1088 = vmatpush3.msra.mxu0 %v456_v46 }
  0x28   :  { %1053 = vmatprep.subr.mxu1 %v885_v47  ;;  %1089 = vmatprep.subr.mxu0 %v455_v48 }
  0x29   :  { %1054 = vmatpush3.msra.mxu1 %v885_v47  ;;  %1090 = vmatpush3.msra.mxu0 %v455_v48 }
  0x2a   :  { %172 = vmatmul.mubr.f32.gmra.mxu0 %v38_v49  ;;  %v884_v49 = vld [vmem:[%s1711_s2 + $0xd8] sm:$0xff] }
  0x2b   :  { %176 = vmatprep.mubr.f32.mxu0 %v42_v50  ;;  %v454_v50 = vld [vmem:[%s1711_s2 + $0x60] sm:$0xff]  ;;  %1055 = vmatprep.subr.mxu1 %v884_v49 }
  0x2c   :  { %1091 = vmatprep.subr.mxu0 %v454_v50  ;;  %1056 = vmatpush3.msra.mxu1 %v884_v49 }
  0x2d   :  { %1092 = vmatpush3.msra.mxu0 %v454_v50 }
  0x2e   :  { %177 = vmatmul.mubr.f32.gmra.mxu0 %v41_v51  ;;  %v883_v51 = vld [vmem:[%s1711_s2 + $0xd0] sm:$0xff] }
  0x2f   :  { %1057 = vmatprep.subr.mxu1 %v883_v51 }
  0x30   :  { %1058 = vmatpush3.msra.mxu1 %v883_v51 }
  0xd7   :  { %v1043_v53 = vpop.f32.mrf.mxu1 }
  0xd9   :  { %v248_v56 = vpop.f32.mrf.mxu1 }
  0xdb   :  { %v1046_v58 = vpop.f32.mrf.mxu1 }
  0xdd   :  { %v258_v0 = vpop.f32.mrf.mxu1 }
  0xe2   :  { %v941_v52 = vpop.f32.mrf.mxu0 }
  0xe4   :  { %v942_v54 = vpop.f32.mrf.mxu0 }
  0xe5   :  { %v943_v59 = vadd.f32 %v942_v54, %v941_v52  ;;  %v453_v52 = vld [vmem:[%s1711_s2 + $0x58] sm:$0xff]  ;;  %v452_v54 = vld [vmem:[%s1711_s2 + $0x50] sm:$0xff] }
  0xe6   :  { %v944_v55 = vpop.f32.mrf.mxu0  ;;  %1093 = vmatprep.subr.mxu0 %v453_v52 }
  0xe7   :  { %v1411_v1 = vadd.f32 %v943_v59, %v248_v56  ;;  %1094 = vmatpush3.msra.mxu0 %v453_v52  ;;  %v451_v56 = vld [vmem:[%s1711_s2 + $0x48] sm:$0xff]  ;;  %v879_v59 = vld [vmem:[%s1711_s2 + $0xb0] sm:$0xff] }
  0xe8   :  { %v945_v57 = vpop.f32.mrf.mxu0  ;;  %1095 = vmatprep.subr.mxu0 %v452_v54 }
  0xe9   :  { %v946_v60 = vadd.f32 %v945_v57, %v944_v55  ;;  %v278_v7 = vmul.f32 %v1411_v1, %v1411_v1  ;;  %v881_v55 = vld [vmem:[%s1711_s2 + $0xc0] sm:$0xff]  ;;  %v880_v57 = vld [vmem:[%s1711_s2 + $0xb8] sm:$0xff]  ;;  %1096 = vmatpush3.msra.mxu0 %v452_v54 }
  0xea   :  { %v947_v61 = vpop.f32.mrf.mxu0  ;;  %1097 = vmatprep.subr.mxu0 %v451_v56 }
  0xeb   :  { %v1409_v62 = vadd.f32 %v1043_v53, %v946_v60  ;;  %v882_v53 = vld [vmem:[%s1711_s2 + $0xc8] sm:$0xff]  ;;  %1098 = vmatpush3.msra.mxu0 %v451_v56  ;;  %v449_v60 = vld [vmem:[%s1711_s2 + $0x38] sm:$0xff] }
  0xec   :  { %v948_v63 = vpop.f32.mrf.mxu0  ;;  %1059 = vmatprep.subr.mxu1 %v882_v53 }
  0xed   :  { %v949_v2 = vadd.f32 %v948_v63, %v947_v61  ;;  %v279_v4 = vmul.f32 %v1409_v62, %v1409_v62  ;;  %v269_v8 = vadd.f32 %v1409_v62, %v1411_v1  ;;  %1060 = vmatpush3.msra.mxu1 %v882_v53  ;;  %v878_v61 = vld [vmem:[%s1711_s2 + $0xa8] sm:$0xff]  ;;  %v448_v63 = vld [vmem:[%s1711_s2 + $0x30] sm:$0xff] }
  0xee   :  { %v950_v3 = vpop.f32.mrf.mxu0  ;;  %1061 = vmatprep.subr.mxu1 %v881_v55 }
  0xef   :  { %v1415_v5 = vadd.f32 %v949_v2, %v258_v0  ;;  %v282_v12 = vadd.f32 %v279_v4, %v278_v7  ;;  %1062 = vmatpush3.msra.mxu1 %v881_v55  ;;  %v877_v0 = vld [vmem:[%s1711_s2 + $0xa0] sm:$0xff]  ;;  %v447_v2 = vld [vmem:[%s1711_s2 + $0x28] sm:$0xff]  ;;  %v875_v4 = vld [vmem:[%s1711_s2 + $0x90] sm:$0xff] }
  0xf0   :  { %v951_v6 = vpop.f32.mrf.mxu0  ;;  %1063 = vmatprep.subr.mxu1 %v880_v57  ;;  %v873_v7 = vld [vmem:[%s1711_s2 + $0x80] sm:$0xff] }
  0xf1   :  { %v280_v9 = vmul.f32 %v1415_v5, %v1415_v5  ;;  %v952_v10 = vadd.f32 %v951_v6, %v950_v3  ;;  %v270_v11 = vadd.f32 %v269_v8, %v1415_v5  ;;  %1064 = vmatpush3.msra.mxu1 %v880_v57  ;;  %v876_v3 = vld [vmem:[%s1711_s2 + $0x98] sm:$0xff]  ;;  %v874_v6 = vld [vmem:[%s1711_s2 + $0x88] sm:$0xff]  ;;  %v1198_v8 = vmov 0.0  }
  0xf2   :  { %1065 = vmatprep.subr.mxu1 %v879_v59  ;;  %409 = vst [vmem:[#allocation2] sm:$0xff] %v1198_v8  ;;  %410 = vst [vmem:[#allocation2 + $0x8] sm:$0xff] %v1198_v8 }
  0xf3   :  { %v1424_v13 = vadd.f32 %v1046_v58, %v952_v10  ;;  %v283_v14 = vadd.f32 %v282_v12, %v280_v9  ;;  %v450_v58 = vld [vmem:[%s1711_s2 + $0x40] sm:$0xff]  ;;  %1066 = vmatpush3.msra.mxu1 %v879_v59  ;;  %411 = vst [vmem:[#allocation2 + $0x10] sm:$0xff] %v1198_v8  ;;  %412 = vst [vmem:[#allocation2 + $0x18] sm:$0xff] %v1198_v8  ;;  %v1527_v9 = vld [vmem:[%s1711_s2 + $0x178] sm:$0xff] }
  0xf4   :  { %1099 = vmatprep.subr.mxu0 %v450_v58  ;;  %1067 = vmatprep.subr.mxu1 %v878_v61  ;;  %413 = vst [vmem:[#allocation2 + $0x20] sm:$0x3] %v1198_v8  ;;  %v446_v10 = vld [vmem:[%s1711_s2 + $0x20] sm:$0xff]  ;;  %v444_v12 = vld [vmem:[%s1711_s2 + $0x10] sm:$0xff] }
  0xf5   :  { %v271_v15 = vadd.f32 %v270_v11, %v1424_v13  ;;  %v281_v16 = vmul.f32 %v1424_v13, %v1424_v13  ;;  %1100 = vmatpush3.msra.mxu0 %v450_v58  ;;  %1068 = vmatpush3.msra.mxu1 %v878_v61  ;;  %v445_v11 = vld [vmem:[%s1711_s2 + $0x18] sm:$0xff] }
  0xf6   :  { %1101 = vmatprep.subr.mxu0 %v449_v60  ;;  %1069 = vmatprep.subr.mxu1 %v877_v0 }
  0xf7   :  { %v284_v17 = vadd.f32 %v283_v14, %v281_v16  ;;  %v272_v18 = vrot.slane %v271_v15, 4  ;;  %1102 = vmatpush3.msra.mxu0 %v449_v60  ;;  %1070 = vmatpush3.msra.mxu1 %v877_v0  ;;  %v443_v14 = vld [vmem:[%s1711_s2 + $0x8] sm:$0xff] }
  0xf8   :  { %1103 = vmatprep.subr.mxu0 %v448_v63  ;;  %1071 = vmatprep.subr.mxu1 %v876_v3 }
  0xf9   :  { %v273_v19 = vadd.f32 %v272_v18, %v271_v15  ;;  %v285_v20 = vrot.slane %v284_v17, 4  ;;  %1104 = vmatpush3.msra.mxu0 %v448_v63  ;;  %1072 = vmatpush3.msra.mxu1 %v876_v3  ;;  %v442_v15 = vld [vmem:[%s1711_s2] sm:$0xff] }
  0xfa   :  { %1105 = vmatprep.subr.mxu0 %v447_v2  ;;  %1073 = vmatprep.subr.mxu1 %v875_v4 }
  0xfb   :  { %v274_v21 = vrot.slane %v273_v19, 2  ;;  %v286_v22 = vadd.f32 %v285_v20, %v284_v17  ;;  %1106 = vmatpush3.msra.mxu0 %v447_v2  ;;  %1074 = vmatpush3.msra.mxu1 %v875_v4 }
  0xfc   :  { %1075 = vmatprep.subr.mxu1 %v874_v6  ;;  %1107 = vmatprep.subr.mxu0 %v446_v10 }
  0xfd   :  { %v275_v23 = vadd.f32 %v274_v21, %v273_v19  ;;  %v287_v24 = vrot.slane %v286_v22, 2  ;;  %1076 = vmatpush3.msra.mxu1 %v874_v6  ;;  %1108 = vmatpush3.msra.mxu0 %v446_v10 }
  0xfe   :  { %1077 = vmatprep.subr.mxu1 %v873_v7  ;;  %1109 = vmatprep.subr.mxu0 %v445_v11 }
  0xff   :  { %v276_v25 = vrot.slane %v275_v23, 1  ;;  %v288_v26 = vadd.f32 %v287_v24, %v286_v22  ;;  %1078 = vmatpush3.msra.mxu1 %v873_v7  ;;  %1110 = vmatpush3.msra.mxu0 %v445_v11 }
 0x100   :  { %1123 = vmatprep.subr.mxu1 %v1527_v9  ;;  %1111 = vmatprep.subr.mxu0 %v444_v12 }
 0x101   :  { %v277_v27 = vadd.f32 %v276_v25, %v275_v23  ;;  %v289_v28 = vrot.slane %v288_v26, 1  ;;  %1112 = vmatpush3.msra.mxu0 %v444_v12 }
 0x102   :  { %1113 = vmatprep.subr.mxu0 %v443_v14 }
 0x103   :  { %291 = vrot.lane.b32.xlu0 %v277_v27, %s1194_s0  ;;  %v290_v29 = vadd.f32 %v289_v28, %v288_v26  ;;  %1114 = vmatpush3.msra.mxu0 %v443_v14  ;;  %v326_v26 = vlaneseq  ;;  %v267_v28 = vld [vmem:[%s1712_s5] sm:$0x1] }
 0x104   :  { %1115 = vmatprep.subr.mxu0 %v442_v15 }
 0x105   :  { %1116 = vmatpush3.msra.mxu0 %v442_v15 }
 0x107   :  { %294 = vrot.lane.b32.xlu0 %v290_v29, %s1194_s0 }
 0x175   :  { %v292_v30 = vpop.permute.xlu0 %291 }
 0x176   :  { %v293_v31 = vadd.f32 %v292_v30, %v277_v27  ;;  %v327_v27 = vshrl.u32 %v326_v26, 7 }
 0x178   :  { %297 = vrot.lane.b32.xlu1 %v293_v31, %s1195_s28 }
 0x179   :  { %v295_v32 = vpop.permute.xlu0 %294 }
 0x17a   :  { %v296_v33 = vadd.f32 %v295_v32, %v290_v29  ;;  %v1550_v29 = vsub.s32 0, %v327_v27  ;;  %v268_v32 = vld [vmem:[%s1713_s6] sm:$0x1] }
 0x17c   :  { %300 = vrot.lane.b32.xlu1 %v296_v33, %s1195_s28 }
 0x1ea   :  { %v298_v34 = vpop.permute.xlu1 %297 }
 0x1eb   :  { %v299_v35 = vadd.f32 %v298_v34, %v293_v31 }
 0x1ed   :  { %303 = vrot.lane.b32.xlu0 %v299_v35, %s1196_s29 }
 0x1ee   :  { %v301_v36 = vpop.permute.xlu1 %300 }
 0x1ef   :  { %v302_v37 = vadd.f32 %v301_v36, %v296_v33 }
 0x1f1   :  { %306 = vrot.lane.b32.xlu1 %v302_v37, %s1196_s29 }
 0x25f   :  { %v304_v38 = vpop.permute.xlu0 %303 }
 0x260   :  { %v1435_v39 = vadd.f32 %v304_v38, %v299_v35 }
 0x262   :  { %309 = vrot.lane.b32.xlu0 %v1435_v39, %s1197_s30 }
 0x263   :  { %v307_v40 = vpop.permute.xlu1 %306 }
 0x264   :  { %v1439_v41 = vadd.f32 %v307_v40, %v302_v37 }
 0x266   :  { %312 = vrot.lane.b32.xlu1 %v1439_v41, %s1197_s30 }
 0x2d4   :  { %v310_v16 = vpop.permute.xlu0 %309 }
 0x2d5   :  { %v311_v17 = vadd.f32 %v310_v16, %v1435_v39 }
 0x2d7   :  { %v315_v18 = vmul.f32 0.001953125, %v311_v17 }
 0x2d8   :  { %v313_v19 = vpop.permute.xlu1 %312 }
 0x2d9   :  { %v314_v20 = vadd.f32 %v313_v19, %v1439_v41  ;;  %v317_v21 = vmul.f32 %v315_v18, %v315_v18 }
 0x2db   :  { %v316_v22 = vmul.f32 0.001953125, %v314_v20 }
 0x2dd   :  { %v318_v23 = vsub.f32 %v316_v22, %v317_v21 }
 0x2df   :  { %v319_v24 = vmax.f32 %v318_v23, 0.0 }
 0x2e1   :  { %v320_v25 = vadd.f32 1e-05, %v319_v24 }
 0x2e3   :  { %1166 = vrsqrt.f32 %v320_v25 }
 0x2f0   :  { %v1167_v30 = vpop.eup %1166 }
 0x2f1   :  { %v322_v31 = vmul.f32 %v1167_v30, %v267_v28 }
 0x2f3   :  { %v323_v33 = vmul.f32 %v322_v31, %v315_v18  ;;  %v329_v34 = vrot.slane %v322_v31, %v1550_v29 }
 0x2f5   :  { %v324_v35 = vsub.f32 %v268_v32, %v323_v33  ;;  %v331_v36 = vmul.f32 %v329_v34, %v1411_v1  ;;  %v332_v38 = vmul.f32 %v329_v34, %v1409_v62  ;;  %v333_v39 = vmul.f32 %v329_v34, %v1415_v5 }
 0x2f6   :  { %v334_v40 = vmul.f32 %v329_v34, %v1424_v13 }
 0x2f7   :  { %v339_v37 = vrot.slane %v324_v35, %v1550_v29 }
 0x2f9   :  { %v1561_v41 = vadd.f32 %v339_v37, %v331_v36  ;;  %v1563_v42 = vadd.f32 %v339_v37, %v332_v38  ;;  %v1565_v43 = vadd.f32 %v339_v37, %v333_v39  ;;  %v1567_v44 = vadd.f32 %v339_v37, %v334_v40  ;;  %v903_v39 = vld [vmem:[%s1711_s2 + $0x170] sm:$0xff] }
 0x2fb   :  { %v345_v45 = vand.u32 2147483647, %v1561_v41  ;;  %v346_v1 = vand.u32 2147483647, %v1563_v42  ;;  %v347_v46 = vand.u32 2147483647, %v1565_v43 }
 0x2fc   :  { %v348_v62 = vand.u32 2147483647, %v1567_v44  ;;  %vm365_vm1 = vcmp.ge.f32.partialorder %v1561_v41, 0.0  ;;  %vm366_vm2 = vcmp.ge.f32.partialorder %v1563_v42, 0.0  ;;  %vm367_vm3 = vcmp.ge.f32.partialorder %v1565_v43, 0.0 }
 0x2fd   :  { %v349_v47 = vsub.f32 0.0, %v345_v45  ;;  %v350_v5 = vsub.f32 0.0, %v346_v1  ;;  %v351_v48 = vsub.f32 0.0, %v347_v46  ;;  %vm368_vm4 = vcmp.ge.f32.partialorder %v1567_v44, 0.0  ;;  %v901_v46 = vld [vmem:[%s1711_s2 + $0x160] sm:$0xff] }
 0x2fe   :  { %v352_v13 = vsub.f32 0.0, %v348_v62  ;;  %v423_v62 = vld [vmem:[%s1714_s3 + $0x8] sm:$0xff] }
 0x2ff   :  { %v353_v49 = vmul.f32 1.442695, %v349_v47  ;;  %v355_v50 = vmul.f32 1.442695, %v350_v5  ;;  %v357_v51 = vmul.f32 1.442695, %v351_v48 }
 0x300   :  { %v359_v52 = vmul.f32 1.442695, %v352_v13 }
 0x301   :  { %1168 = vpow2.f32 %v353_v49  ;;  %v899_v49 = vld [vmem:[%s1711_s2 + $0x150] sm:$0xff] }
 0x302   :  { %1170 = vpow2.f32 %v355_v50 }
 0x303   :  { %1172 = vpow2.f32 %v357_v51 }
 0x304   :  { %1174 = vpow2.f32 %v359_v52  ;;  %v424_v52 = vld [vmem:[%s1714_s3 + $0x10] sm:$0xff] }
 0x30e   :  { %v1169_v53 = vpop.eup %1168 }
 0x30f   :  { %v1171_v54 = vpop.eup %1170  ;;  %v361_v55 = vmul.f32 %v1169_v53, %v1169_v53  ;;  %v369_v56 = vmul.f32 2.0, %v1169_v53 }
 0x310   :  { %v1173_v57 = vpop.eup %1172  ;;  %v362_v58 = vmul.f32 %v1171_v54, %v1171_v54  ;;  %v370_v59 = vmul.f32 2.0, %v1171_v54  ;;  %v898_v54 = vld [vmem:[%s1711_s2 + $0x148] sm:$0xff] }
 0x311   :  { %v1175_v60 = vpop.eup %1174  ;;  %v373_v61 = vadd.f32 1.0, %v369_v56  ;;  %v377_v63 = vadd.f32 %v369_v56, %v361_v55  ;;  %v385_v0 = vmul.f32 2.0, %v361_v55  ;;  %v363_v2 = vmul.f32 %v1173_v57, %v1173_v57  ;;  %v425_v55 = vld [vmem:[%s1714_s3 + $0x18] sm:$0xff] }
 0x312   :  { %v374_v3 = vadd.f32 1.0, %v370_v59  ;;  %v378_v4 = vadd.f32 %v370_v59, %v362_v58  ;;  %v386_v6 = vmul.f32 2.0, %v362_v58  ;;  %v371_v7 = vmul.f32 2.0, %v1173_v57  ;;  %v897_v57 = vld [vmem:[%s1711_s2 + $0x140] sm:$0xff] }
 0x313   :  { %v381_v8 = vsel %vm365_vm1, %v373_v61, %v377_v63  ;;  %v389_v10 = vsel %vm365_vm1, %v385_v0, 2.0  ;;  %v387_v11 = vmul.f32 2.0, %v363_v2  ;;  %v364_v12 = vmul.f32 %v1175_v60, %v1175_v60  ;;  %v895_v61 = vld [vmem:[%s1711_s2 + $0x130] sm:$0xff]  ;;  %v894_v63 = vld [vmem:[%s1711_s2 + $0x128] sm:$0xff]  ;;  %v893_v0 = vld [vmem:[%s1711_s2 + $0x120] sm:$0xff] }
 0x314   :  { %v393_v14 = vadd.f32 %v389_v10, %v381_v8  ;;  %v382_v15 = vsel %vm366_vm2, %v374_v3, %v378_v4  ;;  %v390_v16 = vsel %vm366_vm2, %v386_v6, 2.0  ;;  %v375_v17 = vadd.f32 1.0, %v371_v7  ;;  %v891_v3 = vld [vmem:[%s1711_s2 + $0x110] sm:$0xff]  ;;  %v890_v4 = vld [vmem:[%s1711_s2 + $0x108] sm:$0xff]  ;;  %v889_v6 = vld [vmem:[%s1711_s2 + $0x100] sm:$0xff] }
 0x315   :  { %v394_v18 = vadd.f32 %v390_v16, %v382_v15  ;;  %v379_v19 = vadd.f32 %v371_v7, %v363_v2  ;;  %v391_v20 = vsel %vm367_vm3, %v387_v11, 2.0  ;;  %v372_v21 = vmul.f32 2.0, %v1175_v60  ;;  %v896_v60 = vld [vmem:[%s1711_s2 + $0x138] sm:$0xff]  ;;  %v436_v11 = vld [vmem:[%s1715_s4 + $0x10] sm:$0xff] }
 0x316   :  { %1176 = vrcp.f32 %v393_v14  ;;  %v388_v22 = vmul.f32 2.0, %v364_v12  ;;  %v892_v2 = vld [vmem:[%s1711_s2 + $0x118] sm:$0xff] }
 0x317   :  { %1178 = vrcp.f32 %v394_v18  ;;  %v383_v23 = vsel %vm367_vm3, %v375_v17, %v379_v19  ;;  %v376_v24 = vadd.f32 1.0, %v372_v21  ;;  %v380_v25 = vadd.f32 %v372_v21, %v364_v12  ;;  %v437_v16 = vld [vmem:[%s1715_s4 + $0x18] sm:$0xff] }
 0x318   :  { %v395_v26 = vadd.f32 %v391_v20, %v383_v23  ;;  %v392_v27 = vsel %vm368_vm4, %v388_v22, 2.0 }
 0x319   :  { %v384_v28 = vsel %vm368_vm4, %v376_v24, %v380_v25 }
 0x31a   :  { %1180 = vrcp.f32 %v395_v26  ;;  %v396_v30 = vadd.f32 %v392_v27, %v384_v28 }
 0x31c   :  { %1182 = vrcp.f32 %v396_v30 }
 0x323   :  { %v1177_v31 = vpop.eup %1176 }
 0x324   :  { %v1179_v32 = vpop.eup %1178  ;;  %v398_v33 = vmul.f32 %v1177_v31, %v381_v8  ;;  %v435_v8 = vld [vmem:[%s1715_s4 + $0x8] sm:$0xff] }
 0x325   :  { %v400_v34 = vmul.f32 %v1179_v32, %v382_v15 }
 0x326   :  { %v405_v35 = vmul.f32 %v398_v33, %v1561_v41  ;;  %v902_v41 = vld [vmem:[%s1711_s2 + $0x168] sm:$0xff] }
 0x327   :  { %v1181_v36 = vpop.eup %1180  ;;  %v406_v37 = vmul.f32 %v400_v34, %v1563_v42 }
 0x328   :  { %414 = vst [vmem:[#allocation2 + $0x1] sm:$0xff] %v405_v35  ;;  %1079 = vmatprep.mubr.f32.mxu1 %v405_v35  ;;  %v402_v38 = vmul.f32 %v1181_v36, %v383_v23 }
 0x329   :  { %v1183_v40 = vpop.eup %1182  ;;  %1080 = vmatmul.mubr.f32.vlgmr.msra.gmra.mxu1 %v406_v37  ;;  %415 = vst [vmem:[#allocation2 + $0x9] sm:$0xff] %v406_v37 }
 0x32a   :  { %1124 = vmatpush3.msra.mxu1 %v1527_v9  ;;  %v407_v45 = vmul.f32 %v402_v38, %v1565_v43  ;;  %v404_v1 = vmul.f32 %v1183_v40, %v384_v28  ;;  %v422_v9 = vld [vmem:[%s1714_s3] sm:$0xff] }
 0x32b   :  { %1125 = vmatprep.subr.mxu1 %v903_v39  ;;  %v434_v43 = vld [vmem:[%s1715_s4] sm:$0xff] }
 0x32c   :  { %416 = vst [vmem:[#allocation2 + $0x11] sm:$0xff] %v407_v45  ;;  %1082 = vmatprep.mubr.f32.mxu1 %v407_v45  ;;  %1126 = vmatpush3.msra.mxu1 %v903_v39  ;;  %v408_v42 = vmul.f32 %v404_v1, %v1567_v44  ;;  %v900_v44 = vld [vmem:[%s1711_s2 + $0x158] sm:$0xff] }
 0x32d   :  { %1127 = vmatprep.subr.mxu1 %v902_v41 }
 0x32e   :  { %417 = vst [vmem:[#allocation2 + $0x19] sm:$0xff] %v408_v42  ;;  %1083 = vmatmul.mubr.f32.gmra.mxu1 %v408_v42 }
 0x32f   :  { %1128 = vmatpush3.msra.mxu1 %v902_v41  ;;  %v418_v47 = vld [vmem:[#allocation2] sm:$0xff] }
 0x330   :  { %1129 = vmatprep.subr.mxu1 %v901_v46  ;;  %v426_v5 = vmul.f32 %v422_v9, %v418_v47  ;;  %v430_v48 = vld [vmem:[#allocation2 + $0x2] sm:$0xff] }
 0x331   :  { %v419_v13 = vld [vmem:[#allocation2 + $0x8] sm:$0xff]  ;;  %1130 = vmatpush3.msra.mxu1 %v901_v46  ;;  %v438_v50 = vmul.f32 %v434_v43, %v430_v48 }
 0x332   :  { %v427_v51 = vmul.f32 %v423_v62, %v419_v13  ;;  %1131 = vmatprep.subr.mxu1 %v900_v44  ;;  %1117 = vmatprep.mubr.f32.mxu0 %v426_v5 }
 0x333   :  { %1132 = vmatpush3.msra.mxu1 %v900_v44  ;;  %1155 = vmatprep.mubr.f32.mxu1 %v438_v50  ;;  %v420_v53 = vld [vmem:[#allocation2 + $0x10] sm:$0xff] }
 0x334   :  { %1133 = vmatprep.subr.mxu1 %v899_v49  ;;  %1118 = vmatmul.mubr.f32.vlgmr.msra.gmra.mxu0 %v427_v51  ;;  %v428_v56 = vmul.f32 %v424_v52, %v420_v53  ;;  %v431_v7 = vld [vmem:[#allocation2 + $0xa] sm:$0xff] }
 0x335   :  { %1134 = vmatpush3.msra.mxu1 %v899_v49  ;;  %v421_v58 = vld [vmem:[#allocation2 + $0x18] sm:$0xff]  ;;  %v439_v12 = vmul.f32 %v435_v8, %v431_v7 }
 0x336   :  { %1120 = vmatprep.mubr.f32.mxu0 %v428_v56  ;;  %1135 = vmatprep.subr.mxu1 %v898_v54  ;;  %v429_v59 = vmul.f32 %v425_v55, %v421_v58  ;;  %v432_v10 = vld [vmem:[#allocation2 + $0x12] sm:$0xff]  ;;  %v433_v15 = vld [vmem:[#allocation2 + $0x1a] sm:$0xff] }
 0x337   :  { %1136 = vmatpush3.msra.mxu1 %v898_v54  ;;  %v440_v14 = vmul.f32 %v436_v11, %v432_v10  ;;  %v441_v17 = vmul.f32 %v437_v16, %v433_v15 }
 0x338   :  { %1137 = vmatprep.subr.mxu1 %v897_v57  ;;  %1121 = vmatmul.mubr.f32.gmra.mxu0 %v429_v59 }
 0x339   :  { %1138 = vmatpush3.msra.mxu1 %v897_v57 }
 0x33a   :  { %1139 = vmatprep.subr.mxu1 %v896_v60 }
 0x33b   :  { %1140 = vmatpush3.msra.mxu1 %v896_v60 }
 0x33c   :  { %1141 = vmatprep.subr.mxu1 %v895_v61 }
 0x33d   :  { %1142 = vmatpush3.msra.mxu1 %v895_v61 }
 0x33e   :  { %1143 = vmatprep.subr.mxu1 %v894_v63 }
 0x33f   :  { %1144 = vmatpush3.msra.mxu1 %v894_v63 }
 0x340   :  { %1145 = vmatprep.subr.mxu1 %v893_v0 }
 0x341   :  { %1146 = vmatpush3.msra.mxu1 %v893_v0 }
 0x342   :  { %1147 = vmatprep.subr.mxu1 %v892_v2 }
 0x343   :  { %1148 = vmatpush3.msra.mxu1 %v892_v2 }
 0x344   :  { %1149 = vmatprep.subr.mxu1 %v891_v3 }
 0x345   :  { %1150 = vmatpush3.msra.mxu1 %v891_v3 }
 0x346   :  { %1151 = vmatprep.subr.mxu1 %v890_v4 }
 0x347   :  { %1152 = vmatpush3.msra.mxu1 %v890_v4 }
 0x348   :  { %1153 = vmatprep.subr.mxu1 %v889_v6 }
 0x349   :  { %1154 = vmatpush3.msra.mxu1 %v889_v6 }
 0x34a   :  { %1156 = vmatmul.mubr.f32.vlgmr.msra.gmra.mxu1 %v439_v12 }
 0x34b   :  { %1158 = vmatprep.mubr.f32.mxu1 %v440_v14 }
 0x34e   :  { %1159 = vmatmul.mubr.f32.gmra.mxu1 %v441_v17 }
 0x3e9   :  { %v1081_v18 = vpop.f32.mrf.mxu1 }
 0x3eb   :  { %v541_v19 = vpop.f32.mrf.mxu1 }
 0x3ee   :  { %v1084_v21 = vpop.f32.mrf.mxu1 }
 0x3f0   :  { %v551_v23 = vpop.f32.mrf.mxu1 }
 0x3f4   :  { %v1119_v20 = vpop.f32.mrf.mxu0 }
 0x3f5   :  { %v632_v26 = vadd.f32 %v1119_v20, %v1081_v18 }
 0x3f6   :  { %v626_v22 = vpop.f32.mrf.mxu0 }
 0x3f7   :  { %v627_v27 = vadd.f32 %v626_v22, %v541_v19  ;;  %v751_v19 = vld [vmem:[%s1716_s7] sm:$0x1] }
 0x3f8   :  { %v1122_v24 = vpop.f32.mrf.mxu0  ;;  %v752_v22 = vld [vmem:[%s1717_s8] sm:$0x1] }
 0x3f9   :  { %v642_v34 = vadd.f32 %v1122_v24, %v1084_v21 }
 0x3fa   :  { %v636_v28 = vpop.f32.mrf.mxu0 }
 0x3fb   :  { %v637_v35 = vadd.f32 %v636_v28, %v551_v23 }
 0x40a   :  { %v1157_v25 = vpop.f32.mrf.mxu1 }
 0x40b   :  { %v1663_v31 = vadd.f32 %v1157_v25, %v632_v26 }
 0x40c   :  { %v728_v30 = vpop.f32.mrf.mxu1 }
 0x40d   :  { %v1665_v32 = vadd.f32 %v728_v30, %v627_v27  ;;  %v763_v38 = vmul.f32 %v1663_v31, %v1663_v31 }
 0x40e   :  { %v1160_v33 = vpop.f32.mrf.mxu1 }
 0x40f   :  { %v762_v36 = vmul.f32 %v1665_v32, %v1665_v32  ;;  %v753_v39 = vadd.f32 %v1663_v31, %v1665_v32  ;;  %v1673_v40 = vadd.f32 %v1160_v33, %v642_v34 }
 0x410   :  { %v738_v37 = vpop.f32.mrf.mxu1 }
 0x411   :  { %v749_v45 = vadd.f32 %v738_v37, %v637_v35  ;;  %v766_v41 = vadd.f32 %v763_v38, %v762_v36  ;;  %v765_v46 = vmul.f32 %v1673_v40, %v1673_v40 }
 0x413   :  { %v754_v1 = vadd.f32 %v753_v39, %v749_v45  ;;  %v764_v42 = vmul.f32 %v749_v45, %v749_v45 }
 0x415   :  { %v755_v9 = vadd.f32 %v754_v1, %v1673_v40  ;;  %v767_v43 = vadd.f32 %v766_v41, %v764_v42 }
 0x417   :  { %v756_v62 = vrot.slane %v755_v9, 4  ;;  %v768_v44 = vadd.f32 %v767_v43, %v765_v46 }
 0x419   :  { %v757_v47 = vadd.f32 %v756_v62, %v755_v9  ;;  %v769_v5 = vrot.slane %v768_v44, 4 }
 0x41b   :  { %v758_v48 = vrot.slane %v757_v47, 2  ;;  %v770_v13 = vadd.f32 %v769_v5, %v768_v44 }
 0x41d   :  { %v759_v49 = vadd.f32 %v758_v48, %v757_v47  ;;  %v771_v50 = vrot.slane %v770_v13, 2 }
 0x41f   :  { %v760_v51 = vrot.slane %v759_v49, 1  ;;  %v772_v52 = vadd.f32 %v771_v50, %v770_v13 }
 0x421   :  { %v761_v53 = vadd.f32 %v760_v51, %v759_v49  ;;  %v773_v54 = vrot.slane %v772_v52, 1 }
 0x423   :  { %775 = vrot.lane.b32.xlu0 %v761_v53, %s1194_s0  ;;  %v774_v55 = vadd.f32 %v773_v54, %v772_v52 }
 0x425   :  { %778 = vrot.lane.b32.xlu1 %v774_v55, %s1194_s0 }
 0x495   :  { %v776_v56 = vpop.permute.xlu0 %775 }
 0x496   :  { %v777_v57 = vadd.f32 %v776_v56, %v761_v53 }
 0x497   :  { %v779_v58 = vpop.permute.xlu1 %778 }
 0x498   :  { %v780_v59 = vadd.f32 %v779_v58, %v774_v55  ;;  %781 = vrot.lane.b32.xlu0 %v777_v57, %s1195_s28 }
 0x49a   :  { %784 = vrot.lane.b32.xlu1 %v780_v59, %s1195_s28 }
 0x50a   :  { %v782_v60 = vpop.permute.xlu0 %781 }
 0x50b   :  { %v783_v61 = vadd.f32 %v782_v60, %v777_v57 }
 0x50c   :  { %v785_v63 = vpop.permute.xlu1 %784 }
 0x50d   :  { %v786_v0 = vadd.f32 %v785_v63, %v780_v59  ;;  %787 = vrot.lane.b32.xlu0 %v783_v61, %s1196_s29 }
 0x50f   :  { %790 = vrot.lane.b32.xlu1 %v786_v0, %s1196_s29 }
 0x57f   :  { %v788_v2 = vpop.permute.xlu0 %787 }
 0x580   :  { %v789_v3 = vadd.f32 %v788_v2, %v783_v61 }
 0x581   :  { %v791_v4 = vpop.permute.xlu1 %790 }
 0x582   :  { %v792_v6 = vadd.f32 %v791_v4, %v786_v0  ;;  %793 = vrot.lane.b32.xlu0 %v789_v3, %s1197_s30 }
 0x584   :  { %796 = vrot.lane.b32.xlu1 %v792_v6, %s1197_s30 }
 0x5f4   :  { %v794_v7 = vpop.permute.xlu0 %793 }
 0x5f5   :  { %v795_v8 = vadd.f32 %v794_v7, %v789_v3 }
 0x5f6   :  { %v797_v10 = vpop.permute.xlu1 %796 }
 0x5f7   :  { %v799_v11 = vmul.f32 0.001953125, %v795_v8  ;;  %v798_v12 = vadd.f32 %v797_v10, %v792_v6 }
 0x5f9   :  { %v801_v14 = vmul.f32 %v799_v11, %v799_v11  ;;  %v800_v15 = vmul.f32 0.001953125, %v798_v12 }
 0x5fb   :  { %v802_v16 = vsub.f32 %v800_v15, %v801_v14 }
 0x5fd   :  { %v803_v17 = vmax.f32 %v802_v16, 0.0 }
 0x5ff   :  { %v804_v18 = vadd.f32 1e-05, %v803_v17 }
 0x601   :  { %1184 = vrsqrt.f32 %v804_v18 }
 0x60e   :  { %v1185_v20 = vpop.eup %1184 }
 0x60f   :  { %v806_v21 = vmul.f32 %v1185_v20, %v751_v19 }
 0x611   :  { %v807_v23 = vmul.f32 %v806_v21, %v799_v11  ;;  %v813_v24 = vrot.slane %v806_v21, %v1550_v29 }
 0x613   :  { %v808_v25 = vsub.f32 %v752_v22, %v807_v23  ;;  %v815_v26 = vmul.f32 %v813_v24, %v1665_v32  ;;  %v816_v27 = vmul.f32 %v813_v24, %v1663_v31  ;;  %v817_v28 = vmul.f32 %v813_v24, %v749_v45 }
 0x614   :  { %v818_v30 = vmul.f32 %v813_v24, %v1673_v40 }
 0x615   :  { %v823_v33 = vrot.slane %v808_v25, %v1550_v29 }
 0x617   :  { %v825_v34 = vadd.f32 %v823_v33, %v815_v26  ;;  %v826_v35 = vadd.f32 %v823_v33, %v816_v27  ;;  %v827_v36 = vadd.f32 %v823_v33, %v817_v28  ;;  %v828_v37 = vadd.f32 %v823_v33, %v818_v30 }
 0x619   :  { %v833_v38 = vmin.f32 %v825_v34, 0.0  ;;  %v834_v39 = vmin.f32 %v826_v35, 0.0  ;;  %v835_v41 = vmin.f32 %v827_v36, 0.0  ;;  %v836_v1 = vmin.f32 %v828_v37, 0.0 }
 0x61a   :  { %vm829_vm5 = vcmp.gt.f32.partialorder %v825_v34, 0.0  ;;  %vm830_vm6 = vcmp.gt.f32.partialorder %v826_v35, 0.0  ;;  %vm831_vm7 = vcmp.gt.f32.partialorder %v827_v36, 0.0  ;;  %vm832_vm8 = vcmp.gt.f32.partialorder %v828_v37, 0.0 }
 0x61b   :  { %v837_v42 = vmul.f32 1.442695, %v833_v38  ;;  %v839_v46 = vmul.f32 1.442695, %v834_v39  ;;  %v841_v9 = vmul.f32 1.442695, %v835_v41 }
 0x61c   :  { %v843_v43 = vmul.f32 1.442695, %v836_v1 }
 0x61d   :  { %1186 = vpow2.f32 %v837_v42 }
 0x61e   :  { %1188 = vpow2.f32 %v839_v46 }
 0x61f   :  { %1190 = vpow2.f32 %v841_v9 }
 0x620   :  { %1192 = vpow2.f32 %v843_v43 }
 0x62a   :  { %v1187_v31 = vpop.eup %1186 }
 0x62b   :  { %v1189_v32 = vpop.eup %1188  ;;  %v905_v40 = vadd.f32 -1.0, %v1187_v31 }
 0x62c   :  { %v1191_v29 = vpop.eup %1190  ;;  %v906_v45 = vadd.f32 -1.0, %v1189_v32 }
 0x62d   :  { %v1193_v62 = vpop.eup %1192  ;;  %v907_v44 = vadd.f32 -1.0, %v1191_v29  ;;  %v849_v47 = vmul.f32 1.6732632, %v905_v40 }
 0x62e   :  { %v908_v5 = vadd.f32 -1.0, %v1193_v62  ;;  %v850_v48 = vmul.f32 1.6732632, %v906_v45 }
 0x62f   :  { %v851_v13 = vmul.f32 1.6732632, %v907_v44  ;;  %v853_v49 = vsel %vm829_vm5, %v825_v34, %v849_v47 }
 0x630   :  { %v852_v50 = vmul.f32 1.6732632, %v908_v5  ;;  %v854_v51 = vsel %vm830_vm6, %v826_v35, %v850_v48  ;;  %v857_v52 = vmul.f32 1.050701, %v853_v49 }
 0x631   :  { %v855_v53 = vsel %vm831_vm7, %v827_v36, %v851_v13  ;;  %v858_v54 = vmul.f32 1.050701, %v854_v51 }
 0x632   :  { %v856_v55 = vsel %vm832_vm8, %v828_v37, %v852_v50  ;;  %v859_v56 = vmul.f32 1.050701, %v855_v53  ;;  %861 = vst [vmem:[%s1718_s9] sm:$0xff] %v857_v52 }
 0x633   :  { %v860_v57 = vmul.f32 1.050701, %v856_v55  ;;  %862 = vst [vmem:[%s1718_s9 + $0x8] sm:$0xff] %v858_v54 }
 0x634   :  { %863 = vst [vmem:[%s1718_s9 + $0x10] sm:$0xff] %v859_v56 }
 0x635   :  { %864 = vst [vmem:[%s1718_s9 + $0x18] sm:$0xff] %v860_v57 }

</bundles_post_ra>
